<compile_context>
chip_gen: v6e
topology: v6e:2x2x1
jax: 0.10.0
libtpu: 0.0.40
codegen_flags: <defaults>
</compile_context>

<pallas_src>
import functools

import jax
import jax.numpy as jnp
from jax import lax
from jax.experimental import pallas as pl
from jax.experimental.pallas import tpu as pltpu

XI = 10.0
EPS = 1.0
IP = 1
NUM_CLASSES = 10


# ---------------------------------------------------------------------------
# Fused VAT kernel: everything VMEM-resident, single (1,1) output.
# ---------------------------------------------------------------------------
def vat_kernel(x_ref, noise_ref, w_ref, b_ref, kl_ref, *, xi, eps, ip):
    """x:(N,D)  noise:(N,D)  w:(C,D)  b:(1,C)  ->  kl:(1,1) batchmean KL."""
    x = x_ref[...]                      # (N, D)
    w = w_ref[...]                      # (C, D)  -- single weight copy in VMEM
    b = b_ref[...]                      # (1, C)
    n = x.shape[0]
    inv_n = jnp.float32(1.0 / n)

    # Contract D (last dim of x) with D (last dim of w):  (N,D)·(C,D) -> (N,C)
    dn = (((1,), (1,)), ((), ()))

    def linear(xp):
        return lax.dot_general(xp, w, dimension_numbers=dn,
                               preferred_element_type=jnp.float32) + b

    def log_softmax(z):                 # (N, C) -> (N, C)
        m = jnp.max(z, axis=-1, keepdims=True)
        zs = z - m
        lse = jnp.log(jnp.sum(jnp.exp(zs), axis=-1, keepdims=True))
        return zs - lse

    def l2_normalize(d):                # matches torch: d / (||d||_2 + 1e-8)
        norm = jnp.sqrt(jnp.sum(d * d, axis=-1, keepdims=True))  # (N, 1)
        inv = 1.0 / (norm + 1e-8)       # tiny (N,1) divide; (N,D) work is a mul
        return d * inv

    # pred = softmax(model(x)); keep log_pred around (computed exactly once,
    # and finite for finite logits -> no 0 * log(0) NaN in the KL terms).
    log_pred = log_softmax(linear(x))   # (N, C)
    pred = jnp.exp(log_pred)            # (N, C)

    def kl_rows(logp_hat):              # (N, C) -> (1, 1) batchmean KL
        per = pred * (log_pred - logp_hat)
        row = jnp.sum(per, axis=-1, keepdims=True)          # (N, 1)
        return jnp.sum(row, axis=0, keepdims=True) * inv_n  # (1, 1)

    # d = l2_normalize(randn_like(x))
    d = l2_normalize(noise_ref[...])

    # Power iteration(s): d, pred, log_pred, W all stay resident across iters.
    # ip is static and tiny -> unroll in Python for full LLO visibility.
    for _ in range(ip):
        logits_hat = linear(x + jnp.float32(xi) * d)
        logp_hat = log_softmax(logits_hat)
        p_hat = jnp.exp(logp_hat)
        grad_logits = (p_hat - pred) * inv_n                 # dKL/dlogits
        # backward through the linear model: (N,C) @ (C,D) -> (N,D)
        grad_input = jnp.dot(grad_logits, w,
                             preferred_element_type=jnp.float32)
        d = l2_normalize(jnp.float32(xi) * grad_input)

    # lds = KL(pred || softmax(model(x + eps*d))), batchmean
    logp_hat = log_softmax(linear(x + jnp.float32(eps) * d))
    kl_ref[...] = kl_rows(logp_hat)


# ---------------------------------------------------------------------------
# Wrapper: one pallas_call, full-array blocks (shapes are tiny and fit VMEM).
# TODO(synk): for realistic N, tile the batch axis (grid over N, "parallel"
# dimension_semantics for v7x dual TCs) and reduce per-tile KL partial sums.
# ---------------------------------------------------------------------------
def _full_spec(shape):
    return pl.BlockSpec(shape, lambda i: (0,) * len(shape))


@functools.partial(jax.jit, static_argnames=("xi", "eps", "ip"))
def vat_loss(x, w, b, noise_key, xi=XI, eps=EPS, ip=IP):
    n, c, h, wd = x.shape
    d_dim = c * h * wd
    x_flat = x.reshape(n, d_dim).astype(jnp.float32)
    w32 = w.astype(jnp.float32)                  # (C, D) -- no transpose
    b2 = b.reshape(1, -1).astype(jnp.float32)    # (1, C)
    noise = jax.random.normal(noise_key, (n, d_dim), dtype=jnp.float32)

    kernel = functools.partial(vat_kernel, xi=float(xi), eps=float(eps),
                               ip=int(ip))
    kl = pl.pallas_call(
        kernel,
        grid=(1,),
        in_specs=[_full_spec(x_flat.shape),
                  _full_spec(noise.shape),
                  _full_spec(w32.shape),
                  _full_spec(b2.shape)],
        out_specs=_full_spec((1, 1)),
        out_shape=jax.ShapeDtypeStruct((1, 1), jnp.float32),
        compiler_params=pltpu.CompilerParams(
            dimension_semantics=("arbitrary",)),
    )(x_flat, noise, w32, b2)
    return kl[0, 0]


# ---------------------------------------------------------------------------
if __name__ == "__main__":
    key = jax.random.PRNGKey(0)
    k_x, k_w, k_b, k_noise = jax.random.split(key, 4)

    # Small NCHW input consistent with a conv-style classifier input.
    N, C, H, W = 2, 4, 16, 16
    D = C * H * W
    x = jax.random.normal(k_x, (N, C, H, W), dtype=jnp.float32)

    # Deterministic synthetic linear-classifier params (nn.Linear-style init).
    bound = 1.0 / jnp.sqrt(jnp.float32(D))
    w = jax.random.uniform(k_w, (NUM_CLASSES, D), jnp.float32, -bound, bound)
    b = jax.random.uniform(k_b, (NUM_CLASSES,), jnp.float32, -bound, bound)

    lds = vat_loss(x, w, b, k_noise)
    jax.block_until_ready(lds)
    assert lds.shape == () and jnp.isfinite(lds)
    print("KERNEL_OK")
</pallas_src>

<mosaic_0001>
module attributes {stable_mosaic.version = 11 : i64} {
  func.func @vat_kernel(%arg0: i32, %arg1: memref<2x1024xf32, #tpu.memory_space<vmem>>, %arg2: memref<2x1024xf32, #tpu.memory_space<vmem>>, %arg3: memref<10x1024xf32, #tpu.memory_space<vmem>>, %arg4: memref<1x10xf32, #tpu.memory_space<vmem>>, %arg5: memref<1x1xf32, #tpu.memory_space<vmem>>) attributes {dimension_semantics = [#tpu.dimension_semantics<arbitrary>], iteration_bounds = array<i64: 1>, scalar_prefetch = 0 : i64, scratch_operands = 0 : i64, tpu.core_type = #tpu.core_type<tc>, window_params = [{pipeline_mode = #tpu.pipeline_mode<synchronous>, transform_indices = @transform_0, window_bounds = array<i64: 2, 1024>}, {pipeline_mode = #tpu.pipeline_mode<synchronous>, transform_indices = @transform_1, window_bounds = array<i64: 2, 1024>}, {pipeline_mode = #tpu.pipeline_mode<synchronous>, transform_indices = @transform_2, window_bounds = array<i64: 10, 1024>}, {pipeline_mode = #tpu.pipeline_mode<synchronous>, transform_indices = @transform_3, window_bounds = array<i64: 1, 10>}, {pipeline_mode = #tpu.pipeline_mode<synchronous>, transform_indices = @transform_4, window_bounds = array<i64: 1, 1>}]} {
    %c0 = arith.constant 0 : index
    %c0_0 = arith.constant 0 : index
    %0 = vector.load %arg1[%c0, %c0_0] : memref<2x1024xf32, #tpu.memory_space<vmem>>, vector<2x1024xf32>
    %c0_1 = arith.constant 0 : index
    %c0_2 = arith.constant 0 : index
    %1 = vector.load %arg3[%c0_1, %c0_2] : memref<10x1024xf32, #tpu.memory_space<vmem>>, vector<10x1024xf32>
    %c0_3 = arith.constant 0 : index
    %c0_4 = arith.constant 0 : index
    %2 = vector.load %arg4[%c0_3, %c0_4] : memref<1x10xf32, #tpu.memory_space<vmem>>, vector<1x10xf32>
    %cst = arith.constant dense<0.000000e+00> : vector<2x10xf32>
    %3 = tpu.matmul %0, %1, %cst {dimension_numbers = #tpu.dot_dimension_numbers<[1], [1], [0], [0], [0, 0, 1, 0], [], []>} : vector<2x1024xf32>, vector<10x1024xf32>, vector<2x10xf32> -> vector<2x10xf32>
    %4 = vector.broadcast %2 : vector<1x10xf32> to vector<2x10xf32>
    %5 = arith.addf %3, %4 : vector<2x10xf32>
    %cst_5 = arith.constant dense<0xFF800000> : vector<2xf32>
    %6 = vector.multi_reduction <maximumf>, %5, %cst_5 [1] : vector<2x10xf32> to vector<2xf32>
    %7 = vector.shape_cast %6 : vector<2xf32> to vector<2x1xf32>
    %8 = vector.broadcast %7 : vector<2x1xf32> to vector<2x10xf32>
    %9 = arith.subf %5, %8 : vector<2x10xf32>
    %10 = math.exp %9 : vector<2x10xf32>
    %cst_6 = arith.constant dense<0.000000e+00> : vector<2xf32>
    %11 = vector.multi_reduction <add>, %10, %cst_6 [1] : vector<2x10xf32> to vector<2xf32>
    %12 = vector.shape_cast %11 : vector<2xf32> to vector<2x1xf32>
    %13 = math.log %12 : vector<2x1xf32>
    %14 = vector.broadcast %13 : vector<2x1xf32> to vector<2x10xf32>
    %15 = arith.subf %9, %14 : vector<2x10xf32>
    %16 = math.exp %15 : vector<2x10xf32>
    %c0_7 = arith.constant 0 : index
    %c0_8 = arith.constant 0 : index
    %17 = vector.load %arg2[%c0_7, %c0_8] : memref<2x1024xf32, #tpu.memory_space<vmem>>, vector<2x1024xf32>
    %18 = arith.mulf %17, %17 : vector<2x1024xf32>
    %cst_9 = arith.constant dense<0.000000e+00> : vector<2xf32>
    %19 = vector.multi_reduction <add>, %18, %cst_9 [1] : vector<2x1024xf32> to vector<2xf32>
    %20 = vector.shape_cast %19 : vector<2xf32> to vector<2x1xf32>
    %21 = math.sqrt %20 : vector<2x1xf32>
    %cst_10 = arith.constant 9.99999993E-9 : f32
    %22 = vector.broadcast %cst_10 : f32 to vector<2x1xf32>
    %23 = arith.addf %21, %22 : vector<2x1xf32>
    %cst_11 = arith.constant 1.000000e+00 : f32
    %24 = vector.broadcast %cst_11 : f32 to vector<2x1xf32>
    %25 = arith.divf %24, %23 : vector<2x1xf32>
    %26 = vector.broadcast %25 : vector<2x1xf32> to vector<2x1024xf32>
    %27 = arith.mulf %17, %26 : vector<2x1024xf32>
    %cst_12 = arith.constant 1.000000e+01 : f32
    %28 = vector.broadcast %cst_12 : f32 to vector<2x1024xf32>
    %29 = arith.mulf %28, %27 : vector<2x1024xf32>
    %30 = arith.addf %0, %29 : vector<2x1024xf32>
    %cst_13 = arith.constant dense<0.000000e+00> : vector<2x10xf32>
    %31 = tpu.matmul %30, %1, %cst_13 {dimension_numbers = #tpu.dot_dimension_numbers<[1], [1], [0], [0], [0, 0, 1, 0], [], []>} : vector<2x1024xf32>, vector<10x1024xf32>, vector<2x10xf32> -> vector<2x10xf32>
    %32 = vector.broadcast %2 : vector<1x10xf32> to vector<2x10xf32>
    %33 = arith.addf %31, %32 : vector<2x10xf32>
    %cst_14 = arith.constant dense<0xFF800000> : vector<2xf32>
    %34 = vector.multi_reduction <maximumf>, %33, %cst_14 [1] : vector<2x10xf32> to vector<2xf32>
    %35 = vector.shape_cast %34 : vector<2xf32> to vector<2x1xf32>
    %36 = vector.broadcast %35 : vector<2x1xf32> to vector<2x10xf32>
    %37 = arith.subf %33, %36 : vector<2x10xf32>
    %38 = math.exp %37 : vector<2x10xf32>
    %cst_15 = arith.constant dense<0.000000e+00> : vector<2xf32>
    %39 = vector.multi_reduction <add>, %38, %cst_15 [1] : vector<2x10xf32> to vector<2xf32>
    %40 = vector.shape_cast %39 : vector<2xf32> to vector<2x1xf32>
    %41 = math.log %40 : vector<2x1xf32>
    %42 = vector.broadcast %41 : vector<2x1xf32> to vector<2x10xf32>
    %43 = arith.subf %37, %42 : vector<2x10xf32>
    %44 = math.exp %43 : vector<2x10xf32>
    %45 = arith.subf %44, %16 : vector<2x10xf32>
    %cst_16 = arith.constant 5.000000e-01 : f32
    %46 = vector.broadcast %cst_16 : f32 to vector<2x10xf32>
    %47 = arith.mulf %45, %46 : vector<2x10xf32>
    %cst_17 = arith.constant dense<0.000000e+00> : vector<2x1024xf32>
    %48 = tpu.matmul %47, %1, %cst_17 {dimension_numbers = #tpu.dot_dimension_numbers<[1], [0], [0], [1], [0, 0, 1, 1], [], []>} : vector<2x10xf32>, vector<10x1024xf32>, vector<2x1024xf32> -> vector<2x1024xf32>
    %cst_18 = arith.constant 1.000000e+01 : f32
    %49 = vector.broadcast %cst_18 : f32 to vector<2x1024xf32>
    %50 = arith.mulf %49, %48 : vector<2x1024xf32>
    %51 = arith.mulf %50, %50 : vector<2x1024xf32>
    %cst_19 = arith.constant dense<0.000000e+00> : vector<2xf32>
    %52 = vector.multi_reduction <add>, %51, %cst_19 [1] : vector<2x1024xf32> to vector<2xf32>
    %53 = vector.shape_cast %52 : vector<2xf32> to vector<2x1xf32>
    %54 = math.sqrt %53 : vector<2x1xf32>
    %cst_20 = arith.constant 9.99999993E-9 : f32
    %55 = vector.broadcast %cst_20 : f32 to vector<2x1xf32>
    %56 = arith.addf %54, %55 : vector<2x1xf32>
    %cst_21 = arith.constant 1.000000e+00 : f32
    %57 = vector.broadcast %cst_21 : f32 to vector<2x1xf32>
    %58 = arith.divf %57, %56 : vector<2x1xf32>
    %59 = vector.broadcast %58 : vector<2x1xf32> to vector<2x1024xf32>
    %60 = arith.mulf %50, %59 : vector<2x1024xf32>
    %cst_22 = arith.constant 1.000000e+00 : f32
    %61 = vector.broadcast %cst_22 : f32 to vector<2x1024xf32>
    %62 = arith.mulf %61, %60 : vector<2x1024xf32>
    %63 = arith.addf %0, %62 : vector<2x1024xf32>
    %cst_23 = arith.constant dense<0.000000e+00> : vector<2x10xf32>
    %64 = tpu.matmul %63, %1, %cst_23 {dimension_numbers = #tpu.dot_dimension_numbers<[1], [1], [0], [0], [0, 0, 1, 0], [], []>} : vector<2x1024xf32>, vector<10x1024xf32>, vector<2x10xf32> -> vector<2x10xf32>
    %65 = vector.broadcast %2 : vector<1x10xf32> to vector<2x10xf32>
    %66 = arith.addf %64, %65 : vector<2x10xf32>
    %cst_24 = arith.constant dense<0xFF800000> : vector<2xf32>
    %67 = vector.multi_reduction <maximumf>, %66, %cst_24 [1] : vector<2x10xf32> to vector<2xf32>
    %68 = vector.shape_cast %67 : vector<2xf32> to vector<2x1xf32>
    %69 = vector.broadcast %68 : vector<2x1xf32> to vector<2x10xf32>
    %70 = arith.subf %66, %69 : vector<2x10xf32>
    %71 = math.exp %70 : vector<2x10xf32>
    %cst_25 = arith.constant dense<0.000000e+00> : vector<2xf32>
    %72 = vector.multi_reduction <add>, %71, %cst_25 [1] : vector<2x10xf32> to vector<2xf32>
    %73 = vector.shape_cast %72 : vector<2xf32> to vector<2x1xf32>
    %74 = math.log %73 : vector<2x1xf32>
    %75 = vector.broadcast %74 : vector<2x1xf32> to vector<2x10xf32>
    %76 = arith.subf %70, %75 : vector<2x10xf32>
    %77 = arith.subf %15, %76 : vector<2x10xf32>
    %78 = arith.mulf %16, %77 : vector<2x10xf32>
    %cst_26 = arith.constant dense<0.000000e+00> : vector<2xf32>
    %79 = vector.multi_reduction <add>, %78, %cst_26 [1] : vector<2x10xf32> to vector<2xf32>
    %80 = vector.shape_cast %79 : vector<2xf32> to vector<2x1xf32>
    %cst_27 = arith.constant dense<0.000000e+00> : vector<1xf32>
    %81 = vector.multi_reduction <add>, %80, %cst_27 [0] : vector<2x1xf32> to vector<1xf32>
    %82 = vector.shape_cast %81 : vector<1xf32> to vector<1x1xf32>
    %cst_28 = arith.constant 5.000000e-01 : f32
    %83 = vector.broadcast %cst_28 : f32 to vector<1x1xf32>
    %84 = arith.mulf %82, %83 : vector<1x1xf32>
    %c0_29 = arith.constant 0 : index
    %c0_30 = arith.constant 0 : index
    %85 = vector.load %arg5[%c0_29, %c0_30] : memref<1x1xf32, #tpu.memory_space<vmem>>, vector<1x1xf32>
    tpu.vector_store %arg5[%c0_29, %c0_30], %84 {strides = array<i32>} : memref<1x1xf32, #tpu.memory_space<vmem>>, vector<1x1xf32>,
    return
  }
  func.func @transform_0(%arg0: i32) -> (i32, i32) {
    %c0_i32 = arith.constant 0 : i32
    %c0_i32_0 = arith.constant 0 : i32
    %c0_i32_1 = arith.constant 0 : i32
    return %c0_i32, %c0_i32_0 : i32, i32
  }
  func.func @transform_1(%arg0: i32) -> (i32, i32) {
    %c0_i32 = arith.constant 0 : i32
    %c0_i32_0 = arith.constant 0 : i32
    %c0_i32_1 = arith.constant 0 : i32
    return %c0_i32, %c0_i32_0 : i32, i32
  }
  func.func @transform_2(%arg0: i32) -> (i32, i32) {
    %c0_i32 = arith.constant 0 : i32
    %c0_i32_0 = arith.constant 0 : i32
    %c0_i32_1 = arith.constant 0 : i32
    return %c0_i32, %c0_i32_0 : i32, i32
  }
  func.func @transform_3(%arg0: i32) -> (i32, i32) {
    %c0_i32 = arith.constant 0 : i32
    %c0_i32_0 = arith.constant 0 : i32
    %c0_i32_1 = arith.constant 0 : i32
    return %c0_i32, %c0_i32_0 : i32, i32
  }
  func.func @transform_4(%arg0: i32) -> (i32, i32) {
    %c0_i32 = arith.constant 0 : i32
    %c0_i32_0 = arith.constant 0 : i32
    %c0_i32_1 = arith.constant 0 : i32
    return %c0_i32, %c0_i32_0 : i32, i32
  }
}

</mosaic_0001>

<bundles_post_ra>
// kernel: vat_loss.1
= control target key start
LH: loop header
LB: loop body
LE: loop exit
PB: predicated region body
PF: predicated region fallthrough
CT: control target
= control target key end

     0   :  { %v49_v0 = vlaneseq  ;;  %v1652_v3 = vmov 1983009808   ;;  %s1938_s0 = inlined_call_operand.vmem [shape: f32[2,1024], index: 0, kind: input, shape index: {}]   ;;  %s1939_s1 = inlined_call_operand.vmem [shape: f32[2,1024], index: 1, kind: input, shape index: {}]   ;;  %s1940_s2 = inlined_call_operand.vmem [shape: f32[10,1024], index: 2, kind: input, shape index: {}]   ;;  %s1941_s3 = inlined_call_operand.vmem [shape: f32[1,10], index: 3, kind: input, shape index: {}]   ;;  %s1942_s4 = inlined_call_operand.hbm [shape: f32[1,1], index: 4, kind: output, shape index: {}]  }
   0x1   :  { %v1684_v1 = vld [vmem:[%s1939_s1] sm:$0xff]  ;;  %v1689_v2 = vld [vmem:[%s1940_s2 + $0x8] sm:$0xff]  ;;  %v47_v4 = vunpack.c.l.s4 %v1652_v3  ;;  %v1706_v8 = vld [vmem:[%s1940_s2 + $0x58] sm:$0x3] }
   0x2   :  { %v384_v5 = vmul.f32 %v1684_v1, %v1684_v1  ;;  %v1696_v6 = vld [vmem:[%s1940_s2 + $0x48] sm:$0x3]  ;;  %v1701_v7 = vld [vmem:[%s1940_s2 + $0x40] sm:$0x3]  ;;  %v1708_v9 = vshrl.u32 %v49_v0, 7  ;;  %185 = vmatprep.subr.mxu1 %v1706_v8  ;;  %v1725_v12 = vld [vmem:[%s1940_s2 + $0x18] sm:$0xff] }
   0x3   :  { %v1713_v10 = vld [vmem:[%s1939_s1 + $0x8] sm:$0xff]  ;;  %115 = vmatprep.subr.mxu0 %v1696_v6  ;;  %v1720_v11 = vld [vmem:[%s1940_s2 + $0x50] sm:$0x3]  ;;  %v48_v13 = vunpack.c.0.s8 %v47_v4  ;;  %v1732_v15 = vld [vmem:[%s1938_s0] sm:$0xff] }
   0x4   :  { %v388_v14 = vcombine.high %v384_v5, %v384_v5  ;;  %116 = vmatpush1.xpose.msra.mxu0 %v1701_v7  ;;  %186 = vmatpush1.xpose.msra.mxu1 %v1720_v11  ;;  %v1738_v16 = vld [vmem:[%s1940_s2] sm:$0xff]  ;;  %v45_v17 = vcombine.high %v1732_v15, %v1732_v15  ;;  %v385_v19 = vmul.f32 %v1713_v10, %v1713_v10  ;;  %v1751_v20 = vld [vmem:[%s1940_s2 + $0x10] sm:$0xff]  ;;  %v1756_v21 = vld [vmem:[%s1940_s2 + $0x68] sm:$0x3] }
   0x5   :  { %117 = vmatprep.subr.mxu0 %v1689_v2  ;;  %187 = vmatprep.subr.mxu1 %v1725_v12  ;;  %v1744_v18 = vsub.s32 %v48_v13, %v1708_v9  ;;  %v1761_v22 = vld [vmem:[%s1940_s2 + $0x78] sm:$0x3] }
   0x6   :  { %9 = vsyncpa [#allocation3], 0  ;;  %vm430_vm0 = vcmask 1041408   ;;  %v1769_v25 = vld [vmem:[%s1938_s0 + $0x8] sm:$0xff]  ;;  %v405_v30 = vcombine.high %v385_v19, %v385_v19  ;;  %v1788_v42 = vld [vmem:[%s1940_s2 + $0x60] sm:$0x3] }
   0x7   :  { %v395_v23 = vrot.slane %v384_v5, %v1744_v18  ;;  %v402_v24 = vrot.slane %v388_v14, %v1744_v18  ;;  %v52_v26 = vrot.slane %v1732_v15, %v1744_v18  ;;  %v59_v27 = vrot.slane %v45_v17, %v1744_v18  ;;  %v1793_v43 = vld [vmem:[%s1940_s2 + $0x70] sm:$0x3]  ;;  %v1800_v46 = vld [vmem:[%s1940_s2 + $0x28] sm:$0xff]  ;;  %v1805_v47 = vld [vmem:[%s1940_s2 + $0x38] sm:$0xff] }
   0x8   :  { %118 = vmatpush1.xpose.msra.mxu0 %v1738_v16  ;;  %188 = vmatpush1.xpose.msra.mxu1 %v1751_v20  ;;  %v412_v31 = vrot.slane %v385_v19, %v1744_v18  ;;  %v69_v33 = vrot.slane %v1769_v25, %v1744_v18  ;;  %v419_v39 = vrot.slane %v405_v30, %v1744_v18  ;;  %v1816_v54 = vld [vmem:[%s1940_s2 + $0x20] sm:$0xff]  ;;  %v1822_v55 = vld [vmem:[%s1940_s2 + $0x30] sm:$0xff]  ;;  %v1653_v17 = vmov 269488144  }
   0x9   :  { %255 = vmatprep.subr.mxu0 %v1756_v21  ;;  %v403_v28 = vcombine.high %v395_v23, %v395_v23  ;;  %v404_v29 = vcombine.high %v402_v24, %v402_v24  ;;  %325 = vmatprep.subr.mxu1 %v1761_v22  ;;  %v431_v32 = vsel %vm430_vm0, %v395_v23, 0.0  ;;  %v434_v35 = vsel %vm430_vm0, %v402_v24, 0.0 }
   0xa   :  { %v60_v37 = vcombine.high %v52_v26, %v52_v26  ;;  %v61_v38 = vcombine.high %v59_v27, %v59_v27  ;;  %v420_v40 = vcombine.high %v412_v31, %v412_v31  ;;  %v62_v44 = vcombine.high %v1769_v25, %v1769_v25 }
   0xb   :  { %v432_v34 = vsel %vm430_vm0, %v403_v28, 0.0  ;;  %v436_v41 = vsel %vm430_vm0, %v404_v29, 0.0  ;;  %v77_v48 = vcombine.high %v69_v33, %v69_v33  ;;  %v438_v49 = vsel %vm430_vm0, %v412_v31, 0.0 }
   0xc   :  { %v433_v36 = vadd.f32 %v432_v34, %v431_v32  ;;  %151 = vmatprep.mubr.f32.mxu0 %v60_v37  ;;  %221 = vmatprep.mubr.f32.mxu1 %v61_v38  ;;  %v76_v50 = vrot.slane %v62_v44, %v1744_v18  ;;  %v421_v52 = vcombine.high %v419_v39, %v419_v39  ;;  %v440_v53 = vsel %vm430_vm0, %v420_v40, 0.0 }
   0xd   :  { %152 = vmatmul.mubr.f32.vlgmr.msra.gmra.mxu0 %v52_v26  ;;  %222 = vmatmul.mubr.f32.vlgmr.msra.gmra.mxu1 %v59_v27  ;;  %v442_v58 = vsel %vm430_vm0, %v419_v39, 0.0  ;;  %v460_v19 = vunpack.c.l.s4 %v1653_v17  ;;  %vm367_vm3 = vcmask 74752   ;;  %vm813_vm4 = vcmask 80896  }
   0xe   :  { %v435_v45 = vadd.f32 %v434_v35, %v433_v36  ;;  %256 = vmatpush1.xpose.msra.mxu0 %v1788_v42  ;;  %326 = vmatpush1.xpose.msra.mxu1 %v1793_v43  ;;  %v78_v56 = vcombine.high %v76_v50, %v76_v50  ;;  %v444_v60 = vsel %vm430_vm0, %v421_v52, 0.0  ;;  %vm1571_vm7 = vcmask 0  }
   0xf   :  { %257 = vmatprep.subr.mxu0 %v1800_v46  ;;  %327 = vmatprep.subr.mxu1 %v1805_v47  ;;  %v461_v23 = vunpack.c.0.s8 %v460_v19 }
  0x10   :  { %v437_v51 = vadd.f32 %v436_v41, %v435_v45  ;;  %291 = vmatprep.mubr.f32.mxu0 %v77_v48  ;;  %361 = vmatprep.mubr.f32.mxu1 %v78_v56 }
  0x11   :  { %v464_v24 = vsub.s32 %v461_v23, %v1708_v9  ;;  %v1847_v9 = vld [vmem:[%s1941_s3] ss:$0 sm:$0xff]  ;;  %s1655_s3 = smov [#allocation2]  }
  0x12   :  { %v439_v57 = vadd.f32 %v438_v49, %v437_v51  ;;  %258 = vmatpush1.xpose.msra.mxu0 %v1816_v54  ;;  %328 = vmatpush1.xpose.msra.mxu1 %v1822_v55  ;;  %s1579_s28 = sshll.u32 %s1655_s3, 4  ;;  %s1580_s28 = int_to_ptr.vmem [resolvable:$true] %s1579_s28 }
  0x13   :  { %545 = vmatprep.subr.mxu0 %v1696_v6  ;;  %615 = vmatprep.subr.mxu1 %v1706_v8  ;;  %s1630_s29 = scalar_lea.vmem %s1580_s28, 16  ;;  %s1634_s30 = scalar_lea.vmem %s1580_s28, 32 }
  0x14   :  { %v441_v59 = vadd.f32 %v440_v53, %v439_v57  ;;  %p1631_p0 = scmp.ne.s32.totalorder %s1580_s28, %s1630_s29  ;;  %p1635_p1 = scmp.lt.s32.totalorder %s1580_s28, %s1580_s28 }
  0x15   :  { %292 = vmatmul.mubr.f32.vlgmr.msra.gmra.mxu0 %v69_v33  ;;  %362 = vmatmul.mubr.f32.vlgmr.msra.gmra.mxu1 %v76_v50  ;;  %p1636_p2 = scmp.lt.s32.totalorder %s1634_s30, %s1630_s29 }
  0x16   :  { %v443_v61 = vadd.f32 %v442_v58, %v441_v59  ;;  %546 = vmatpush1.xpose.msra.mxu0 %v1701_v7  ;;  %616 = vmatpush1.xpose.msra.mxu1 %v1720_v11 }
  0x17   :  { %547 = vmatprep.subr.mxu0 %v1689_v2  ;;  %617 = vmatprep.subr.mxu1 %v1725_v12  ;;  %p1637_p3 = por %p1636_p2, %p1635_p1 }
  0x18   :  { %v445_v62 = vadd.f32 %v444_v60, %v443_v61 }
  0x19   :  { %p1638_p4 = pnand %p1637_p3, %p1631_p0 }
  0x1a   :  { %446 = vadd.xlane.f32.xlu0 %v445_v62  ;;  %548 = vmatpush1.xpose.msra.mxu0 %v1738_v16 }
  0x1b   :  { %618 = vmatpush1.xpose.msra.mxu1 %v1751_v20  ;;  %685 = vmatprep.subr.mxu0 %v1756_v21 }
  0x1c   :  { %755 = vmatprep.subr.mxu1 %v1761_v22 }
  0xa3   :  { %v447_v63 = vpop.xlane.xlu0 %446 }
  0xa4   :  { %1606 = vrsqrt.f32 %v447_v63  ;;  %vm450_vm1 = vcmp.eq.f32.partialorder %v447_v63, inf  ;;  %v453_v4 = vand.u32 2147483648, %v447_v63  ;;  %vm452_vm2 = vcmp.eq.f32.partialorder %v447_v63, 0.0 }
  0xb1   :  { %v1607_v0 = vpop.eup %1606 }
  0xb2   :  { %v449_v3 = vmul.f32 %v1607_v0, %v447_v63 }
  0xb4   :  { %v451_v5 = vsel %vm450_vm1, %v447_v63, %v449_v3 }
  0xb5   :  { %v454_v13 = vsel %vm452_vm2, %v453_v4, %v451_v5 }
  0xb6   :  { %v455_v14 = vadd.f32 1e-08, %v454_v13 }
  0xb8   :  { %1608 = vrcp.f32 %v455_v14 }
  0xc5   :  { %v1609_v26 = vpop.eup %1608 }
  0xc6   :  { %v465_v27 = vrot.slane %v1609_v26, %v464_v24 }
  0xc8   :  { %v467_v28 = vmul.f32 %v465_v27, %v1684_v1  ;;  %v468_v29 = vmul.f32 %v465_v27, %v1713_v10 }
  0xca   :  { %v469_v30 = vmul.f32 10.0, %v467_v28  ;;  %v470_v31 = vmul.f32 10.0, %v468_v29 }
  0xcc   :  { %v471_v32 = vadd.f32 %v469_v30, %v1732_v15  ;;  %v472_v33 = vadd.f32 %v470_v31, %v1769_v25 }
  0xcd   :  { %v153_v1 = vpop.f32.mrf.mxu0  ;;  %v223_v38 = vpop.f32.mrf.mxu1 }
  0xce   :  { %v482_v34 = vrot.slane %v471_v32, %v1744_v18  ;;  %v475_v35 = vcombine.high %v471_v32, %v471_v32  ;;  %v492_v36 = vcombine.high %v472_v33, %v472_v33  ;;  %v499_v37 = vrot.slane %v472_v33, %v1744_v18 }
  0xcf   :  { %v154_v41 = vadd.f32 %v1847_v9, %v153_v1  ;;  %v155_v44 = vpop.f32.mrf.mxu0  ;;  %v225_v45 = vpop.f32.mrf.mxu1 }
  0xd0   :  { %v490_v10 = vcombine.high %v482_v34, %v482_v34  ;;  %v489_v39 = vrot.slane %v475_v35, %v1744_v18  ;;  %v506_v40 = vrot.slane %v492_v36, %v1744_v18  ;;  %v507_v49 = vcombine.high %v499_v37, %v499_v37 }
  0xd1   :  { %v224_v50 = vadd.f32 %v223_v38, %v154_v41  ;;  %v1654_v36 = vmov 0.0  }
  0xd2   :  { %581 = vmatprep.mubr.f32.mxu0 %v490_v10  ;;  %v491_v48 = vcombine.high %v489_v39, %v489_v39  ;;  %v508_v51 = vcombine.high %v506_v40, %v506_v40 }
  0xd3   :  { %582 = vmatmul.mubr.f32.vlgmr.msra.gmra.mxu0 %v482_v34 }
  0xd4   :  { %686 = vmatpush1.xpose.msra.mxu0 %v1788_v42  ;;  %651 = vmatprep.mubr.f32.mxu1 %v491_v48 }
  0xd5   :  { %721 = vmatprep.mubr.f32.mxu0 %v507_v49  ;;  %652 = vmatmul.mubr.f32.vlgmr.msra.gmra.mxu1 %v489_v39  ;;  %v293_v52 = vpop.f32.mrf.mxu0  ;;  %v363_v53 = vpop.f32.mrf.mxu1 }
  0xd6   :  { %756 = vmatpush1.xpose.msra.mxu1 %v1793_v43  ;;  %687 = vmatprep.subr.mxu0 %v1800_v46  ;;  %v294_v56 = vadd.f32 %v293_v52, %v224_v50 }
  0xd7   :  { %791 = vmatprep.mubr.f32.mxu1 %v508_v51  ;;  %757 = vmatprep.subr.mxu1 %v1805_v47  ;;  %v295_v57 = vpop.f32.mrf.mxu0  ;;  %v365_v58 = vpop.f32.mrf.mxu1 }
  0xd8   :  { %688 = vmatpush1.xpose.msra.mxu0 %v1816_v54  ;;  %v364_v59 = vadd.f32 %v363_v53, %v294_v56 }
  0xd9   :  { %1588 = vmatprep.subr.msk.mxu0 %vm430_vm0, %v1696_v6 }
  0xda   :  { %758 = vmatpush1.xpose.msra.mxu1 %v1822_v55  ;;  %v368_v60 = vsel %vm367_vm3, %v364_v59, -inf }
  0xdb   :  { %722 = vmatmul.mubr.f32.vlgmr.msra.gmra.mxu0 %v499_v37  ;;  %1591 = vmatprep.subr.msk.mxu1 %vm430_vm0, %v1706_v8 }
  0xdc   :  { %1589 = vmatpush1.msk.msra.mxu0 %vm430_vm0, %v1701_v7  ;;  %369 = vmax.xlane.f32.xlu0 %v368_v60 }
  0xdd   :  { %792 = vmatmul.mubr.f32.vlgmr.msra.gmra.mxu1 %v506_v40  ;;  %871 = vmatprep.subr.mxu0 %v1689_v2 }
  0xde   :  { %1592 = vmatpush1.msk.msra.mxu1 %vm430_vm0, %v1720_v11  ;;  %872 = vmatpush1.msra.mxu0 %v1738_v16 }
  0xdf   :  { %942 = vmatprep.subr.mxu1 %v1725_v12  ;;  %1594 = vmatprep.subr.msk.mxu0 %vm430_vm0, %v1756_v21 }
  0xe0   :  { %943 = vmatpush1.msra.mxu1 %v1751_v20  ;;  %905 = vmatprep.mubr.f32.mxu0 %v1654_v36 }
  0xe1   :  { %1597 = vmatprep.subr.msk.mxu1 %vm430_vm0, %v1761_v22  ;;  %976 = vmatprep.mubr.f32.mxu1 %v1654_v36 }
 0x165   :  { %v370_v61 = vpop.xlane.xlu0 %369 }
 0x166   :  { %v371_v62 = vsub.f32 %v364_v59, %v370_v61 }
 0x168   :  { %v372_v63 = vmul.f32 1.442695, %v371_v62 }
 0x16a   :  { %1610 = vpow2.f32 %v372_v63 }
 0x177   :  { %v1611_v29 = vpop.eup %1610 }
 0x178   :  { %v374_v30 = vsel %vm367_vm3, %v1611_v29, 0.0 }
 0x193   :  { %v583_v0 = vpop.f32.mrf.mxu0 }
 0x194   :  { %v584_v5 = vadd.f32 %v1847_v9, %v583_v0 }
 0x195   :  { %v585_v3 = vpop.f32.mrf.mxu0  ;;  %v653_v4 = vpop.f32.mrf.mxu1 }
 0x196   :  { %v654_v14 = vadd.f32 %v653_v4, %v584_v5 }
 0x197   :  { %v655_v13 = vpop.f32.mrf.mxu1 }
 0x19b   :  { %v723_v17 = vpop.f32.mrf.mxu0 }
 0x19c   :  { %v724_v19 = vadd.f32 %v723_v17, %v654_v14 }
 0x19d   :  { %v725_v23 = vpop.f32.mrf.mxu0  ;;  %v793_v24 = vpop.f32.mrf.mxu1 }
 0x19e   :  { %v794_v26 = vadd.f32 %v793_v24, %v724_v19 }
 0x19f   :  { %v795_v27 = vpop.f32.mrf.mxu1 }
 0x1a0   :  { %v797_v28 = vsel %vm367_vm3, %v794_v26, -inf }
 0x1a1   :  { %798 = vmax.xlane.f32.xlu1 %v797_v28 }
 0x1a5   :  { %375 = vadd.xlane.f32.xlu1 %v374_v30 }
 0x22a   :  { %v799_v31 = vpop.xlane.xlu1 %798 }
 0x22b   :  { %v800_v32 = vsub.f32 %v794_v26, %v799_v31 }
 0x22d   :  { %v801_v33 = vmul.f32 1.442695, %v800_v32 }
 0x22e   :  { %v376_v37 = vpop.xlane.xlu1 %375 }
 0x22f   :  { %1612 = vpow2.f32 %v801_v33 }
 0x230   :  { %1614 = vlog2.f32 %v376_v37 }
 0x23c   :  { %v1613_v34 = vpop.eup %1612 }
 0x23d   :  { %v803_v35 = vsel %vm367_vm3, %v1613_v34, 0.0  ;;  %v1615_v38 = vpop.eup %1614 }
 0x23e   :  { %804 = vadd.xlane.f32.xlu0 %v803_v35  ;;  %v378_v10 = vmul.f32 0.6931472, %v1615_v38 }
 0x240   :  { %v1880_v39 = vsub.f32 %v371_v62, %v378_v10 }
 0x242   :  { %v380_v44 = vmul.f32 1.442695, %v1880_v39 }
 0x2c7   :  { %v805_v1 = vpop.xlane.xlu0 %804 }
 0x2c8   :  { %1616 = vlog2.f32 %v805_v1 }
 0x2c9   :  { %1618 = vpow2.f32 %v380_v44 }
 0x2d5   :  { %v1617_v40 = vpop.eup %1616 }
 0x2d6   :  { %v807_v41 = vmul.f32 0.6931472, %v1617_v40  ;;  %v1883_v49 = vpop.eup %1618 }
 0x2d8   :  { %v808_v45 = vsub.f32 %v800_v32, %v807_v41 }
 0x2da   :  { %v809_v48 = vmul.f32 1.442695, %v808_v45 }
 0x2dc   :  { %1620 = vpow2.f32 %v809_v48 }
 0x2e9   :  { %v1621_v50 = vpop.eup %1620 }
 0x2ea   :  { %v811_v51 = vsub.f32 %v1621_v50, %v1883_v49 }
 0x2ec   :  { %v812_v52 = vmul.f32 0.5, %v811_v51 }
 0x2ee   :  { %1590 = vmatmul.mubr.msk.f32.vlgmr.msra.gmra.mxu0 %vm813_vm4, %v812_v52  ;;  %1593 = vmatmul.mubr.msk.f32.vlgmr.msra.gmra.mxu1 %vm813_vm4, %v812_v52 }
 0x2ef   :  { %1595 = vmatpush1.msk.msra.mxu0 %vm430_vm0, %v1788_v42  ;;  %1598 = vmatpush1.msk.msra.mxu1 %vm430_vm0, %v1793_v43 }
 0x2f0   :  { %1013 = vmatprep.subr.mxu0 %v1800_v46  ;;  %1084 = vmatprep.subr.mxu1 %v1805_v47 }
 0x2f1   :  { %1014 = vmatpush1.msra.mxu0 %v1816_v54  ;;  %1047 = vmatprep.mubr.f32.mxu0 %v1654_v36 }
 0x2f2   :  { %1085 = vmatpush1.msra.mxu1 %v1822_v55  ;;  %1118 = vmatprep.mubr.f32.mxu1 %v1654_v36 }
 0x2f3   :  { %1596 = vmatmul.mubr.msk.f32.vlgmr.msra.gmra.mxu0 %vm813_vm4, %v812_v52  ;;  %1599 = vmatmul.mubr.msk.f32.vlgmr.msra.gmra.mxu1 %vm813_vm4, %v812_v52 }
 0x2f4   :  { %1294 = vmatprep.subr.mxu0 %v1696_v6  ;;  %1364 = vmatprep.subr.mxu1 %v1706_v8 }
 0x2f5   :  { %1295 = vmatpush1.xpose.msra.mxu0 %v1701_v7  ;;  %1365 = vmatpush1.xpose.msra.mxu1 %v1720_v11 }
 0x2f6   :  { %1296 = vmatprep.subr.mxu0 %v1689_v2  ;;  %1366 = vmatprep.subr.mxu1 %v1725_v12 }
 0x2f9   :  { %1297 = vmatpush1.xpose.msra.mxu0 %v1738_v16  ;;  %1367 = vmatpush1.xpose.msra.mxu1 %v1751_v20 }
 0x2fa   :  { %1434 = vmatprep.subr.mxu0 %v1756_v21  ;;  %1504 = vmatprep.subr.mxu1 %v1761_v22 }
 0x3ae   :  { %v907_v53 = vpop.f32.mrf.mxu0  ;;  %v978_v6 = vpop.f32.mrf.mxu1 }
 0x3af   :  { %v1125_v56 = vmul.f32 10.0, %v907_v53  ;;  %v1127_v8 = vmul.f32 10.0, %v978_v6 }
 0x3b0   :  { %v909_v57 = vpop.f32.mrf.mxu0  ;;  %v980_v7 = vpop.f32.mrf.mxu1 }
 0x3b1   :  { %v1133_v58 = vmul.f32 %v1125_v56, %v1125_v56  ;;  %v1126_v11 = vmul.f32 10.0, %v909_v57  ;;  %v1128_v59 = vmul.f32 10.0, %v980_v7  ;;  %v1135_v2 = vmul.f32 %v1127_v8, %v1127_v8 }
 0x3b3   :  { %v1134_v60 = vmul.f32 %v1126_v11, %v1126_v11  ;;  %v1049_v12 = vpop.f32.mrf.mxu0  ;;  %v1120_v61 = vpop.f32.mrf.mxu1  ;;  %v1141_v20 = vsel %vm430_vm0, %v1133_v58, 0.0  ;;  %v1136_v62 = vmul.f32 %v1128_v59, %v1128_v59  ;;  %v1144_v4 = vsel %vm430_vm0, %v1135_v2, 0.0 }
 0x3b4   :  { %v1129_v16 = vmul.f32 10.0, %v1049_v12  ;;  %v1131_v13 = vmul.f32 10.0, %v1120_v61 }
 0x3b5   :  { %v1142_v21 = vsel %vm430_vm0, %v1134_v60, 0.0  ;;  %v1051_v22 = vpop.f32.mrf.mxu0  ;;  %v1122_v3 = vpop.f32.mrf.mxu1  ;;  %v1146_v17 = vsel %vm430_vm0, %v1136_v62, 0.0 }
 0x3b6   :  { %v1143_v63 = vadd.f32 %v1142_v21, %v1141_v20  ;;  %v1130_v0 = vmul.f32 10.0, %v1051_v22  ;;  %v1137_v5 = vmul.f32 %v1129_v16, %v1129_v16  ;;  %v1132_v23 = vmul.f32 10.0, %v1122_v3 }
 0x3b7   :  { %v1139_v27 = vmul.f32 %v1131_v13, %v1131_v13 }
 0x3b8   :  { %v1145_v14 = vadd.f32 %v1144_v4, %v1143_v63  ;;  %v1138_v19 = vmul.f32 %v1130_v0, %v1130_v0  ;;  %v1148_v26 = vsel %vm430_vm0, %v1137_v5, 0.0  ;;  %v1140_v30 = vmul.f32 %v1132_v23, %v1132_v23 }
 0x3b9   :  { %v1152_v32 = vsel %vm430_vm0, %v1139_v27, 0.0 }
 0x3ba   :  { %v1147_v24 = vadd.f32 %v1146_v17, %v1145_v14  ;;  %v1150_v29 = vsel %vm430_vm0, %v1138_v19, 0.0  ;;  %v1154_v34 = vsel %vm430_vm0, %v1140_v30, 0.0 }
 0x3bc   :  { %v1149_v28 = vadd.f32 %v1148_v26, %v1147_v24 }
 0x3be   :  { %v1151_v31 = vadd.f32 %v1150_v29, %v1149_v28 }
 0x3c0   :  { %v1153_v33 = vadd.f32 %v1152_v32, %v1151_v31 }
 0x3c2   :  { %v1155_v35 = vadd.f32 %v1154_v34, %v1153_v33 }
 0x3c4   :  { %1156 = vadd.xlane.f32.xlu1 %v1155_v35 }
 0x44d   :  { %v1157_v36 = vpop.xlane.xlu1 %1156 }
 0x44e   :  { %1622 = vrsqrt.f32 %v1157_v36  ;;  %vm1160_vm5 = vcmp.eq.f32.partialorder %v1157_v36, inf  ;;  %v1163_v38 = vand.u32 2147483648, %v1157_v36  ;;  %vm1162_vm6 = vcmp.eq.f32.partialorder %v1157_v36, 0.0 }
 0x45b   :  { %v1623_v37 = vpop.eup %1622 }
 0x45c   :  { %v1159_v1 = vmul.f32 %v1623_v37, %v1157_v36 }
 0x45e   :  { %v1161_v10 = vsel %vm1160_vm5, %v1157_v36, %v1159_v1 }
 0x45f   :  { %v1164_v40 = vsel %vm1162_vm6, %v1163_v38, %v1161_v10 }
 0x460   :  { %v1165_v41 = vadd.f32 1e-08, %v1164_v40 }
 0x462   :  { %1624 = vrcp.f32 %v1165_v41 }
 0x46f   :  { %v1625_v44 = vpop.eup %1624 }
 0x470   :  { %v1168_v45 = vmul.f32 %v1625_v44, %v1125_v56  ;;  %v1169_v48 = vmul.f32 %v1625_v44, %v1126_v11  ;;  %v1170_v50 = vmul.f32 %v1625_v44, %v1127_v8  ;;  %v1171_v51 = vmul.f32 %v1625_v44, %v1128_v59 }
 0x471   :  { %v1172_v52 = vmul.f32 %v1625_v44, %v1129_v16  ;;  %v1173_v53 = vmul.f32 %v1625_v44, %v1130_v0  ;;  %v1174_v6 = vmul.f32 %v1625_v44, %v1131_v13  ;;  %v1175_v57 = vmul.f32 %v1625_v44, %v1132_v23 }
 0x472   :  { %v1184_v7 = vcombine.low %v1168_v45, %v1169_v48  ;;  %v1185_v58 = vcombine.low %v1170_v50, %v1171_v51 }
 0x473   :  { %v1201_v2 = vcombine.low %v1172_v52, %v1173_v53  ;;  %v1202_v60 = vcombine.low %v1174_v6, %v1175_v57 }
 0x474   :  { %v1192_v12 = vrot.slane %v1184_v7, %v1744_v18  ;;  %v1199_v61 = vrot.slane %v1185_v58, %v1744_v18 }
 0x475   :  { %v1209_v20 = vrot.slane %v1201_v2, %v1744_v18  ;;  %v1216_v21 = vrot.slane %v1202_v60, %v1744_v18 }
 0x476   :  { %v1200_v56 = vcombine.low %v1192_v12, %v1199_v61 }
 0x477   :  { %v1217_v11 = vcombine.low %v1209_v20, %v1216_v21 }
 0x478   :  { %v1220_v8 = vadd.f32 %v1200_v56, %v1732_v15 }
 0x479   :  { %v1221_v59 = vadd.f32 %v1217_v11, %v1769_v25 }
 0x47a   :  { %v1231_v16 = vrot.slane %v1220_v8, %v1744_v18  ;;  %v1224_v62 = vcombine.high %v1220_v8, %v1220_v8 }
 0x47b   :  { %v1248_v22 = vrot.slane %v1221_v59, %v1744_v18  ;;  %v1241_v63 = vcombine.high %v1221_v59, %v1221_v59 }
 0x47c   :  { %v1239_v0 = vcombine.high %v1231_v16, %v1231_v16  ;;  %v1238_v3 = vrot.slane %v1224_v62, %v1744_v18 }
 0x47d   :  { %v1255_v4 = vrot.slane %v1241_v63, %v1744_v18  ;;  %v1256_v13 = vcombine.high %v1248_v22, %v1248_v22 }
 0x47e   :  { %1330 = vmatprep.mubr.f32.mxu0 %v1239_v0  ;;  %v1240_v5 = vcombine.high %v1238_v3, %v1238_v3 }
 0x47f   :  { %1331 = vmatmul.mubr.f32.vlgmr.msra.gmra.mxu0 %v1231_v16  ;;  %v1257_v15 = vcombine.high %v1255_v4, %v1255_v4 }
 0x480   :  { %1435 = vmatpush1.xpose.msra.mxu0 %v1788_v42  ;;  %1400 = vmatprep.mubr.f32.mxu1 %v1240_v5 }
 0x481   :  { %1470 = vmatprep.mubr.f32.mxu0 %v1256_v13  ;;  %1401 = vmatmul.mubr.f32.vlgmr.msra.gmra.mxu1 %v1238_v3 }
 0x482   :  { %1505 = vmatpush1.xpose.msra.mxu1 %v1793_v43  ;;  %1436 = vmatprep.subr.mxu0 %v1800_v46 }
 0x483   :  { %1540 = vmatprep.mubr.f32.mxu1 %v1257_v15  ;;  %1506 = vmatprep.subr.mxu1 %v1805_v47 }
 0x484   :  { %1437 = vmatpush1.xpose.msra.mxu0 %v1816_v54 }
 0x486   :  { %1507 = vmatpush1.xpose.msra.mxu1 %v1822_v55 }
 0x487   :  { %1471 = vmatmul.mubr.f32.vlgmr.msra.gmra.mxu0 %v1248_v22 }
 0x489   :  { %1541 = vmatmul.mubr.f32.vlgmr.msra.gmra.mxu1 %v1255_v4 }
 0x53f   :  { %v1332_v18 = vpop.f32.mrf.mxu0 }
 0x540   :  { %v1333_v14 = vadd.f32 %v1847_v9, %v1332_v18 }
 0x541   :  { %v1334_v25 = vpop.f32.mrf.mxu0  ;;  %v1402_v42 = vpop.f32.mrf.mxu1 }
 0x542   :  { %v1403_v19 = vadd.f32 %v1402_v42, %v1333_v14 }
 0x543   :  { %v1404_v17 = vpop.f32.mrf.mxu1 }
 0x547   :  { %v1472_v23 = vpop.f32.mrf.mxu0 }
 0x548   :  { %v1473_v43 = vadd.f32 %v1472_v23, %v1403_v19 }
 0x549   :  { %v1474_v24 = vpop.f32.mrf.mxu0  ;;  %v1542_v46 = vpop.f32.mrf.mxu1 }
 0x54a   :  { %v1543_v26 = vadd.f32 %v1542_v46, %v1473_v43 }
 0x54b   :  { %v1544_v27 = vpop.f32.mrf.mxu1 }
 0x54c   :  { %v1546_v47 = vsel %vm367_vm3, %v1543_v26, -inf }
 0x54d   :  { %1547 = vmax.xlane.f32.xlu0 %v1546_v47 }
 0x5d6   :  { %v1548_v54 = vpop.xlane.xlu0 %1547 }
 0x5d7   :  { %v1549_v55 = vsub.f32 %v1543_v26, %v1548_v54 }
 0x5d9   :  { %v1550_v28 = vmul.f32 1.442695, %v1549_v55 }
 0x5db   :  { %1626 = vpow2.f32 %v1550_v28 }
 0x5e8   :  { %v1627_v29 = vpop.eup %1626 }
 0x5e9   :  { %v1552_v30 = vsel %vm367_vm3, %v1627_v29, 0.0 }
 0x5ea   :  { %1553 = vadd.xlane.f32.xlu1 %v1552_v30 }
 0x673   :  { %v1554_v9 = vpop.xlane.xlu1 %1553 }
 0x674   :  { %1628 = vlog2.f32 %v1554_v9 }
 0x681   :  { %v1629_v31 = vpop.eup %1628 }
 0x682   :  { %v1556_v32 = vmul.f32 0.6931472, %v1629_v31 }
 0x684   :  { %v1557_v33 = vsub.f32 %v1549_v55, %v1556_v32 }
 0x686   :  { %v1558_v34 = vsub.f32 %v1880_v39, %v1557_v33 }
 0x688   :  { %v1559_v35 = vmul.f32 %v1883_v49, %v1558_v34 }
 0x68a   :  { %v1560_v36 = vsel %vm367_vm3, %v1559_v35, 0.0 }
 0x68b   :  { %1561 = vadd.xlane.f32.xlu0 %v1560_v36 }
 0x714   :  { %v1562_v37 = vpop.xlane.xlu0 %1561 }
 0x715   :  { %v1563_v1 = vsel %vm430_vm0, %v1562_v37, 0.0 }
 0x716   :  { %v1564_v38 = vrot.slane %v1563_v1, 4 }
 0x718   :  { %v1565_v10 = vadd.f32 %v1564_v38, %v1563_v1 }
 0x71a   :  { %v1566_v40 = vrot.slane %v1565_v10, 2 }
 0x71c   :  { %v1567_v41 = vadd.f32 %v1566_v40, %v1565_v10 }
 0x71e   :  { %v1568_v44 = vrot.slane %v1567_v41, 1 }
 0x720   :  { %v1569_v45 = vadd.f32 %v1568_v44, %v1567_v41 }
 0x722   :  { %v1570_v48 = vmul.f32 0.5, %v1569_v45 }
 0x724   :  { %1572 = vst.msk [vmem:[#allocation2] sm:$0x1] %vm1571_vm7, %v1570_v48 }
 0x725   :  { %1641 = shalt.err (!%p1638_p4)
}
 0x726   :  { %1582 = dma.vmem_to_hbm [thread:$0]  %s1580_s28, 16, %s1942_s4, [#allocation3]  }
 0x727   :  { %1650 = dma.done.wait [#allocation3], 16  }
 0x728   :  { %1651 = vsyncadd [#allocation3], 4294967280 }
 0x729   :  { %1586 = vsyncpa [#allocation3], 1 }

</bundles_post_ra>
